<compile_context>
chip_gen: v7x
topology: tpu7x:2x2x1
jax: 0.10.0
libtpu: 0.0.40
codegen_flags: <defaults>
</compile_context>

<pallas_src>
import math
import functools

import jax
import jax.numpy as jnp
from jax import lax
from jax.experimental import pallas as pl
from jax.experimental.pallas import tpu as pltpu


def _round_up(x, mult):
    return ((x + mult - 1) // mult) * mult


def arcface_kernel(label_ref, x_ref, w_ref, out_ref, *, s, cos_m, sin_m, th, mm):
    j = pl.program_id(1)                         # class-tile index (innermost)

    x = x_ref[...].astype(jnp.float32)           # (TB, E)
    w = w_ref[...].astype(jnp.float32)           # (TC, E)
    label = label_ref[...]                       # (TB, 1) int32

    # F.normalize(v) = v / max(||v||, eps)  ==  v * rsqrt(max(||v||^2, eps^2))
    eps2 = 1e-24
    x_n = x * lax.rsqrt(jnp.maximum(jnp.sum(x * x, axis=-1, keepdims=True), eps2))
    w_n = w * lax.rsqrt(jnp.maximum(jnp.sum(w * w, axis=-1, keepdims=True), eps2))

    # Keep MXU operands in bf16 when the inputs are bf16 (accumulate in f32).
    if x_ref.dtype == jnp.bfloat16:
        x_n = x_n.astype(jnp.bfloat16)
        w_n = w_n.astype(jnp.bfloat16)

    # cosine[b, c] = <x_n[b, :], w_n[c, :]>  -- contract dim 1 of both, no .T
    cosine = lax.dot_general(
        x_n, w_n, (((1,), (1,)), ((), ())), preferred_element_type=jnp.float32
    )                                            # (TB, TC)

    tb, tc = cosine.shape
    col0 = j * tc
    col_ids = col0 + lax.broadcasted_iota(jnp.int32, (tb, tc), 1)
    is_target = col_ids == label                 # (TB, TC) via (TB, 1) broadcast

    # Margin math only on the per-row target cosine (TB, 1); rows whose target
    # class lives in another C tile get target_cos = 0 and never use phi.
    target_cos = jnp.sum(jnp.where(is_target, cosine, 0.0), axis=-1, keepdims=True)
    sine_t = jnp.sqrt(jnp.clip(1.0 - target_cos * target_cos, 0.0, 1.0))
    phi_t = target_cos * cos_m - sine_t * sin_m
    phi_t = jnp.where(target_cos > th, phi_t, target_cos - mm)

    out = jnp.where(is_target, phi_t, cosine) * s
    out_ref[...] = out.astype(out_ref.dtype)


def arcface_forward(x, weight, label, s=30.0, m=0.5, *, tile_b=128, tile_c=1024):
    B, E = x.shape
    C, E2 = weight.shape
    assert E == E2

    # Tile sizes respecting the (8, 128) layout constraint; pad ragged dims.
    tb = min(tile_b, _round_up(B, 8))
    tc = min(tile_c, _round_up(C, 128))
    Bp = _round_up(B, tb)
    Cp = _round_up(C, tc)

    xp = x if Bp == B else jnp.pad(x, ((0, Bp - B), (0, 0)))
    wp = weight if Cp == C else jnp.pad(weight, ((0, Cp - C), (0, 0)))
    lab = label.astype(jnp.int32).reshape(B, 1)
    labp = lab if Bp == B else jnp.pad(lab, ((0, Bp - B), (0, 0)), constant_values=-1)

    nb, nc = Bp // tb, Cp // tc

    kernel = functools.partial(
        arcface_kernel,
        s=float(s),
        cos_m=math.cos(m),
        sin_m=math.sin(m),
        th=math.cos(math.pi - m),
        mm=math.sin(math.pi - m) * m,
    )

    out = pl.pallas_call(
        kernel,
        out_shape=jax.ShapeDtypeStruct((Bp, Cp), jnp.float32),
        grid=(nb, nc),  # C innermost: x tile resident, weight streams
        in_specs=[
            pl.BlockSpec((tb, 1), lambda i, j: (i, 0)),   # label
            pl.BlockSpec((tb, E), lambda i, j: (i, 0)),   # x (resident across j)
            pl.BlockSpec((tc, E), lambda i, j: (j, 0)),   # weight (streamed)
        ],
        out_specs=pl.BlockSpec((tb, tc), lambda i, j: (i, j)),
        compiler_params=pltpu.CompilerParams(
            dimension_semantics=("parallel", "parallel"),
            vmem_limit_bytes=48 * 1024 * 1024,
        ),
    )(labp, xp, wp)

    return out[:B, :C]


def arcface_reference(x, weight, label, s=30.0, m=0.5):
    # Pure-JAX reference mirroring the PyTorch module semantics.
    eps = 1e-12
    xn = x / jnp.maximum(jnp.linalg.norm(x, axis=-1, keepdims=True), eps)
    wn = weight / jnp.maximum(jnp.linalg.norm(weight, axis=-1, keepdims=True), eps)
    cosine = xn @ wn.T
    sine = jnp.sqrt(jnp.clip(1.0 - cosine**2, 0.0, 1.0))
    phi = cosine * math.cos(m) - sine * math.sin(m)
    phi = jnp.where(cosine > math.cos(math.pi - m), phi, cosine - math.sin(math.pi - m) * m)
    out = cosine.at[jnp.arange(x.shape[0]), label].set(
        phi[jnp.arange(x.shape[0]), label]
    )
    return out * s


if __name__ == "__main__":
    s_scale, margin = 30.0, 0.5
    key = jax.random.PRNGKey(0)

    # Case 1: multi-tile grid (2 B tiles x 2 C tiles) at small shapes.
    embedding_size, class_num, batch = 32, 256, 16
    k_x, k_w, k_l = jax.random.split(key, 3)
    bound = math.sqrt(6.0 / (embedding_size + class_num))  # xavier_uniform_
    weight = jax.random.uniform(
        k_w, (class_num, embedding_size), minval=-bound, maxval=bound, dtype=jnp.float32
    )
    x = jax.random.normal(k_x, (batch, embedding_size), dtype=jnp.float32)
    label = jax.random.randint(k_l, (batch,), 0, class_num, dtype=jnp.int32)

    out = arcface_forward(x, weight, label, s=s_scale, m=margin, tile_b=8, tile_c=128)
    out = jax.block_until_ready(out)
    ref = arcface_reference(x, weight, label, s=s_scale, m=margin)
    assert out.shape == (batch, class_num)
    assert jnp.allclose(out, ref, atol=1e-4, rtol=1e-4), "mismatch vs reference (case 1)"

    # Case 2: ragged shapes exercise the padding path.
    emb2, cls2, batch2 = 32, 200, 5
    k_x2, k_w2, k_l2 = jax.random.split(jax.random.PRNGKey(1), 3)
    bound2 = math.sqrt(6.0 / (emb2 + cls2))
    weight2 = jax.random.uniform(
        k_w2, (cls2, emb2), minval=-bound2, maxval=bound2, dtype=jnp.float32
    )
    x2 = jax.random.normal(k_x2, (batch2, emb2), dtype=jnp.float32)
    label2 = jax.random.randint(k_l2, (batch2,), 0, cls2, dtype=jnp.int32)

    out2 = arcface_forward(x2, weight2, label2, s=s_scale, m=margin, tile_b=8, tile_c=128)
    out2 = jax.block_until_ready(out2)
    ref2 = arcface_reference(x2, weight2, label2, s=s_scale, m=margin)
    assert out2.shape == (batch2, cls2)
    assert jnp.allclose(out2, ref2, atol=1e-4, rtol=1e-4), "mismatch vs reference (case 2)"

    print("KERNEL_OK")
</pallas_src>

<mosaic_0001>
module attributes {stable_mosaic.version = 11 : i64} {
  func.func @arcface_kernel(%arg0: i32, %arg1: i32, %arg2: memref<8x1xi32, #tpu.memory_space<vmem>>, %arg3: memref<8x32xf32, #tpu.memory_space<vmem>>, %arg4: memref<128x32xf32, #tpu.memory_space<vmem>>, %arg5: memref<8x128xf32, #tpu.memory_space<vmem>>) attributes {dimension_semantics = [#tpu.dimension_semantics<parallel>, #tpu.dimension_semantics<parallel>], iteration_bounds = array<i64: 2, 2>, scalar_prefetch = 0 : i64, scratch_operands = 0 : i64, tpu.core_type = #tpu.core_type<tc>, window_params = [{transform_indices = @transform_0, window_bounds = array<i64: 8, 1>}, {transform_indices = @transform_1, window_bounds = array<i64: 8, 32>}, {transform_indices = @transform_2, window_bounds = array<i64: 128, 32>}, {transform_indices = @transform_3, window_bounds = array<i64: 8, 128>}]} {
    %c0 = arith.constant 0 : index
    %c0_0 = arith.constant 0 : index
    %0 = vector.load %arg3[%c0, %c0_0] : memref<8x32xf32, #tpu.memory_space<vmem>>, vector<8x32xf32>
    %c0_1 = arith.constant 0 : index
    %c0_2 = arith.constant 0 : index
    %1 = vector.load %arg4[%c0_1, %c0_2] : memref<128x32xf32, #tpu.memory_space<vmem>>, vector<128x32xf32>
    %c0_3 = arith.constant 0 : index
    %c0_4 = arith.constant 0 : index
    %2 = vector.load %arg2[%c0_3, %c0_4] : memref<8x1xi32, #tpu.memory_space<vmem>>, vector<8x1xi32>
    %3 = arith.mulf %0, %0 : vector<8x32xf32>
    %cst = arith.constant dense<0.000000e+00> : vector<8xf32>
    %4 = vector.multi_reduction <add>, %3, %cst [1] : vector<8x32xf32> to vector<8xf32>
    %5 = vector.shape_cast %4 : vector<8xf32> to vector<8x1xf32>
    %cst_5 = arith.constant 1.000000e-24 : f32
    %6 = vector.broadcast %cst_5 : f32 to vector<8x1xf32>
    %7 = arith.maximumf %5, %6 : vector<8x1xf32>
    %8 = math.rsqrt %7 : vector<8x1xf32>
    %9 = vector.broadcast %8 : vector<8x1xf32> to vector<8x32xf32>
    %10 = arith.mulf %0, %9 : vector<8x32xf32>
    %11 = arith.mulf %1, %1 : vector<128x32xf32>
    %cst_6 = arith.constant dense<0.000000e+00> : vector<128xf32>
    %12 = vector.multi_reduction <add>, %11, %cst_6 [1] : vector<128x32xf32> to vector<128xf32>
    %13 = vector.shape_cast %12 : vector<128xf32> to vector<128x1xf32>
    %cst_7 = arith.constant 1.000000e-24 : f32
    %14 = vector.broadcast %cst_7 : f32 to vector<128x1xf32>
    %15 = arith.maximumf %13, %14 : vector<128x1xf32>
    %16 = math.rsqrt %15 : vector<128x1xf32>
    %17 = vector.broadcast %16 : vector<128x1xf32> to vector<128x32xf32>
    %18 = arith.mulf %1, %17 : vector<128x32xf32>
    %cst_8 = arith.constant dense<0.000000e+00> : vector<8x128xf32>
    %19 = tpu.matmul %10, %18, %cst_8 {dimension_numbers = #tpu.dot_dimension_numbers<[1], [1], [0], [0], [0, 0, 1, 0], [], []>} : vector<8x32xf32>, vector<128x32xf32>, vector<8x128xf32> -> vector<8x128xf32>
    %c128_i32 = arith.constant 128 : i32
    %20 = arith.muli %arg1, %c128_i32 : i32
    %21 = tpu.iota {dimensions = array<i32: 1>} : vector<8x128xi32>
    %22 = vector.broadcast %20 : i32 to vector<8x128xi32>
    %23 = arith.addi %22, %21 : vector<8x128xi32>
    %24 = vector.broadcast %2 : vector<8x1xi32> to vector<8x128xi32>
    %25 = arith.cmpi eq, %23, %24 : vector<8x128xi32>
    %cst_9 = arith.constant 0.000000e+00 : f32
    %26 = vector.broadcast %cst_9 : f32 to vector<8x128xf32>
    %27 = arith.select %25, %19, %26 : vector<8x128xi1>, vector<8x128xf32>
    %cst_10 = arith.constant dense<0.000000e+00> : vector<8xf32>
    %28 = vector.multi_reduction <add>, %27, %cst_10 [1] : vector<8x128xf32> to vector<8xf32>
    %29 = vector.shape_cast %28 : vector<8xf32> to vector<8x1xf32>
    %30 = arith.mulf %29, %29 : vector<8x1xf32>
    %cst_11 = arith.constant 1.000000e+00 : f32
    %31 = vector.broadcast %cst_11 : f32 to vector<8x1xf32>
    %32 = arith.subf %31, %30 : vector<8x1xf32>
    %cst_12 = arith.constant 0.000000e+00 : f32
    %cst_13 = arith.constant 1.000000e+00 : f32
    %33 = vector.broadcast %cst_12 : f32 to vector<8x1xf32>
    %34 = arith.maximumf %33, %32 : vector<8x1xf32>
    %35 = vector.broadcast %cst_13 : f32 to vector<8x1xf32>
    %36 = arith.minimumf %35, %34 : vector<8x1xf32>
    %37 = math.sqrt %36 : vector<8x1xf32>
    %cst_14 = arith.constant 0.87758255 : f32
    %38 = vector.broadcast %cst_14 : f32 to vector<8x1xf32>
    %39 = arith.mulf %29, %38 : vector<8x1xf32>
    %cst_15 = arith.constant 0.47942555 : f32
    %40 = vector.broadcast %cst_15 : f32 to vector<8x1xf32>
    %41 = arith.mulf %37, %40 : vector<8x1xf32>
    %42 = arith.subf %39, %41 : vector<8x1xf32>
    %cst_16 = arith.constant -0.87758255 : f32
    %43 = vector.broadcast %cst_16 : f32 to vector<8x1xf32>
    %44 = arith.cmpf ogt, %29, %43 : vector<8x1xf32>
    %cst_17 = arith.constant 0.239712775 : f32
    %45 = vector.broadcast %cst_17 : f32 to vector<8x1xf32>
    %46 = arith.subf %29, %45 : vector<8x1xf32>
    %47 = arith.select %44, %42, %46 : vector<8x1xi1>, vector<8x1xf32>
    %48 = vector.shape_cast %47 : vector<8x1xf32> to vector<8x1xf32>
    %49 = vector.broadcast %48 : vector<8x1xf32> to vector<8x128xf32>
    %50 = arith.select %25, %49, %19 : vector<8x128xi1>, vector<8x128xf32>
    %cst_18 = arith.constant 3.000000e+01 : f32
    %51 = vector.broadcast %cst_18 : f32 to vector<8x128xf32>
    %52 = arith.mulf %50, %51 : vector<8x128xf32>
    %c0_19 = arith.constant 0 : index
    %c0_20 = arith.constant 0 : index
    %53 = vector.load %arg5[%c0_19, %c0_20] : memref<8x128xf32, #tpu.memory_space<vmem>>, vector<8x128xf32>
    tpu.vector_store %arg5[%c0_19, %c0_20], %52 {strides = array<i32>} : memref<8x128xf32, #tpu.memory_space<vmem>>, vector<8x128xf32>,
    return
  }
  func.func @transform_0(%arg0: i32, %arg1: i32) -> (i32, i32) {
    %c0_i32 = arith.constant 0 : i32
    %c0_i32_0 = arith.constant 0 : i32
    return %arg0, %c0_i32 : i32, i32
  }
  func.func @transform_1(%arg0: i32, %arg1: i32) -> (i32, i32) {
    %c0_i32 = arith.constant 0 : i32
    %c0_i32_0 = arith.constant 0 : i32
    return %arg0, %c0_i32 : i32, i32
  }
  func.func @transform_2(%arg0: i32, %arg1: i32) -> (i32, i32) {
    %c0_i32 = arith.constant 0 : i32
    %c0_i32_0 = arith.constant 0 : i32
    return %arg1, %c0_i32 : i32, i32
  }
  func.func @transform_3(%arg0: i32, %arg1: i32) -> (i32, i32) {
    %c0_i32 = arith.constant 0 : i32
    return %arg0, %arg1 : i32, i32
  }
}

</mosaic_0001>

<bundles_post_ra>
// kernel: tpu_custom_call.1
= control target key start
LH: loop header
LB: loop body
LE: loop exit
PB: predicated region body
PF: predicated region fallthrough
CT: control target
= control target key end

     0   :  { %8 = vsyncpa [#allocation3], 0  ;;  %s1277_s0 = inlined_call_operand.vmem [shape: s32[16,1], index: 0, kind: input, shape index: {}]   ;;  %s1278_s1 = inlined_call_operand.vmem [shape: f32[16,32], index: 1, kind: input, shape index: {}]   ;;  %s1279_s2 = inlined_call_operand.vmem [shape: f32[256,32], index: 2, kind: input, shape index: {}]   ;;  %s1280_s3 = inlined_call_operand.hbm [shape: f32[16,256], index: 3, kind: output, shape index: {}]  }
   0x1   :  { %10 = vsyncpa [#allocation3 + $0x1], 0  ;;  %s974_s12 = smov 0   ;;  %s976_s13 = smov 0  }
   0x2   :  { %s978_s14 = smov 0   ;;  %s980_s15 = smov 0  }
   0x3   :  { %s982_s16 = smov 0   ;;  %s984_s17 = smov 0  }
   0x4   :  { %s986_s18 = smov 0   ;;  %s988_s19 = smov 0  }
   0x5 LB: > { %s622_s20 = sadd.s32 4294967295, %s947_s19   ;;  %s623_s21 = sadd.s32 4294967294, %s947_s19   ;;  %s947_s19 = sphi %s988_s19, %s16_s19   ;;  %s943_s18 = sphi %s986_s18, %s1291_s18   ;;  %s939_s17 = sphi %s984_s17, %s1290_s17   ;;  %s935_s16 = sphi %s982_s16, %s1289_s16   ;;  %s931_s15 = sphi %s980_s15, %s1288_s15   ;;  %s927_s14 = sphi %s978_s14, %s1287_s14   ;;  %s923_s13 = sphi %s976_s13, %s1286_s13   ;;  %s919_s12 = sphi %s974_s12, %s1285_s12  }
   0x6   : > { %s25_s22 = sadd.s32 1, %s939_s17  ;;  %s28_s23 = sadd.s32 1, %s943_s18 }
   0x7   : > { %p26_p0 = scmp.ge.s32.totalorder %s25_s22, 2  ;;  %p125_p1 = scmp.ne.s32.totalorder %s927_s14, %s923_s13 }
   0x8   : > { %p126_p2 = scmp.eq.s32.totalorder %s622_s20, 3  ;;  %p131_p5 = scmp.ne.s32.totalorder %s923_s13, %s919_s12 }
   0x9   : > { %s1293_s22 = smov (%p26_p0, %s25_s22), 0  ;;  %s1295_s23 = smov (!%p26_p0, %s28_s23), %s943_s18 }
   0xa   : > { %s111_s24 = ssub.s32 %s939_s17, %s1293_s22  ;;  %p1025_p3 = por %p126_p2, %p125_p1 }
   0xb   : > { %p30_p4 = scmp.ge.s32.totalorder %s1295_s23, 2  ;;  %p132_p6 = scmp.eq.s32.totalorder %s623_s21, 3 }
   0xc   : > { %p626_p7 = scmp.ge.s32.totalorder %s947_s19, 1  ;;  %p173_p9 = scmp.lt.s32.totalorder %s947_s19, 5 }
   0xd   : > { %s1297_s23 = smov (%p30_p4, %s1295_s23), 0  ;;  %p1034_p8 = por %p132_p6, %p131_p5 }
   0xe   : > { %s110_s27 = ssub.s32 %s943_s18, %s1297_s23  ;;  %s115_s28 = sadd.s32 1, %s927_s14 }
   0xf   : > { %s112_s29 = sor.u32 %s111_s24, %s110_s27  ;;  %p174_p10 = pnand %p626_p7, %p173_p9 }
  0x10   : > { %p113_p11 = scmp.eq.s32.totalorder %s112_s29, 0  ;;  %s630_s4 = sshll.u32 (!%p174_p10), %s931_s15, 4  ;;  %vm238_vm0 = vcmask (!%p174_p10), 261120   ;;  %v949_v50 = vmov (!%p174_p10), 0.0|0.0   ;;  %vm950_vm1 = vmmov (!%p174_p10), 0   ;;  %v951_v52 = vmov (!%p174_p10), 0.0  }
  0x11   : > { %177 = sbr.rel (%p174_p10) target bundleno = 657 (0x291), region = 32  ;;  %p214_p12 = scmp.lt.s32.totalorder (!%p174_p10), %s630_s4, 31  ;;  %708 = vmatprep.subr.bf16.mxu0 (!%p174_p10), %v949_v50  ;;  %705 = vmatprep.mubr.msk.f32.mxu0 (!%p174_p10), %vm950_vm1, %v951_v52  ;;  %v952_v53 = vmov (!%p174_p10), 0   ;;  %vm1172_vm2 = vmpackc.low (!%p174_p10), %vm238_vm0, %vm238_vm0 }
  0x12   : > { %s1043_s30 = scalar_select %p113_p11, %s927_s14, %s115_s28  }
  0x13   : > { %p205_p13 = scmp.lt.s32.totalorder (!%p174_p10), %s935_s16, 1  ;;  %815 = vset.pattern.permute.xlu1 (!%p174_p10), %v952_v53  ;;  %816 = vset.pattern.permute.xlu0 (!%p174_p10), %v952_v53  ;;  %s649_s29 = sshll.u32 (!%p174_p10), %s931_s15, 7 }
  0x14   : > { %s652_s6 = sshll.u32 (!%p174_p10), %s935_s16, 1  ;;  %s953_s24 = smov (!%p174_p10), [#allocation2]  }
  0x15   : > { %s522_s7 = sadd.s32 (!%p174_p10), %s931_s15, %s652_s6  ;;  %s857_s27 = sshll.u32 (!%p174_p10), %s953_s24, 4  ;;  %s858_s27 = int_to_ptr.vmem [resolvable:$false] %s857_s27 }
  0x18   : > { %s1299_s4 = smov (!%p214_p12, %s630_s4), 31 }
  0x19   : > { %s631_s5 = sshll.u32 %s1299_s4, 3  ;;  %s202_s4 = sand.u32 1, %s923_s13  }
  0x1a   : > { %s1049_s8 = scalar_lea.vmem %s1279_s2, %s631_s5  ;;  %s627_s5 = sshll.u32 %s202_s4, 3 }
  0x1b   : > { %v1052_v0 = vld [vmem:[%s1049_s8] sm:$0xff]  ;;  %v1055_v1 = vld [vmem:[%s1049_s8 + $0x10] sm:$0xff]  ;;  %v1058_v2 = vld [vmem:[%s1049_s8 + $0x8] sm:$0xff]  ;;  %s1117_s9 = scalar_select %p205_p13, %s935_s16, 1 }
  0x1c   : > { %v245_v3 = vmul.f32 %v1052_v0, %v1052_v0  ;;  %v247_v4 = vmul.f32 %v1055_v1, %v1055_v1  ;;  %v246_v5 = vmul.f32 %v1058_v2, %v1058_v2  ;;  %v1067_v6 = vld [vmem:[%s1049_s8 + $0x18] sm:$0xff]  ;;  %v1072_v8 = vld [vmem:[%s1049_s8 + $0x28] sm:$0xff]  ;;  %v1075_v9 = vld [vmem:[%s1049_s8 + $0x20] sm:$0xff]  ;;  %s511_s15 = scalar_lea.sflag [#allocation3], %s202_s4 }
  0x1d   : > { %v248_v7 = vmul.f32 %v1067_v6, %v1067_v6  ;;  %v250_v14 = vmul.f32 %v1072_v8, %v1072_v8  ;;  %v249_v15 = vmul.f32 %v1075_v9, %v1075_v9  ;;  %v1086_v16 = vld [vmem:[%s1049_s8 + $0x38] sm:$0xff]  ;;  %v1089_v17 = vld [vmem:[%s1049_s8 + $0x30] sm:$0xff]  ;;  %v1098_v22 = vld [vmem:[%s1049_s8 + $0x48] sm:$0xff]  ;;  %s628_s10 = sshll.u32 %s1117_s9, 3  ;;  %s204_s9 = scalar_lea.vmem [#allocation2], %s627_s5 }
  0x1e   : > { %v261_v10 = vsel %vm238_vm0, %v245_v3, 0.0  ;;  %v267_v11 = vsel %vm238_vm0, %v247_v4, 0.0  ;;  %v264_v12 = vsel %vm238_vm0, %v246_v5, 0.0  ;;  %v252_v20 = vmul.f32 %v1086_v16, %v1086_v16  ;;  %v1101_v23 = vld [vmem:[%s1049_s8 + $0x40] sm:$0xff]  ;;  %v1111_v28 = vld [vmem:[%s1049_s8 + $0x58] sm:$0xff]  ;;  %v1114_v29 = vld [vmem:[%s1049_s8 + $0x50] sm:$0xff]  ;;  %s212_s21 = scalar_lea.vmem %s1278_s1, %s628_s10  ;;  %s208_s28 = scalar_lea.vmem %s1277_s0, %s628_s10 }
  0x1f   : > { %262 = vadd.xlane.f32.xlu0 %v261_v10  ;;  %268 = vadd.xlane.f32.xlu1 %v267_v11  ;;  %v270_v13 = vsel %vm238_vm0, %v248_v7, 0.0  ;;  %v276_v18 = vsel %vm238_vm0, %v250_v14, 0.0  ;;  %v273_v19 = vsel %vm238_vm0, %v249_v15, 0.0  ;;  %v251_v21 = vmul.f32 %v1089_v17, %v1089_v17  ;;  %v1126_v34 = vld [vmem:[%s1049_s8 + $0x68] sm:$0xff]  ;;  %v1129_v35 = vld [vmem:[%s1049_s8 + $0x60] sm:$0xff]  ;;  %v1139_v40 = vld [vmem:[%s1049_s8 + $0x78] sm:$0xff] }
  0x20   : > { %v282_v24 = vsel %vm238_vm0, %v252_v20, 0.0  ;;  %v254_v26 = vmul.f32 %v1098_v22, %v1098_v22  ;;  %v253_v27 = vmul.f32 %v1101_v23, %v1101_v23  ;;  %v256_v32 = vmul.f32 %v1111_v28, %v1111_v28  ;;  %v1142_v41 = vld [vmem:[%s1049_s8 + $0x70] sm:$0xff]  ;;  %v1155_v46 = vld [vmem:[%s212_s21] sm:$0xff]  ;;  %s653_s8 = sshll.u32 %s522_s7, 7  ;;  %s526_s10 = sshll.u32 %s204_s9, 4  ;;  %s1226_s10 = int_to_ptr.vmem [resolvable:$true] %s526_s10 }
  0x21   : > { %v279_v25 = vsel %vm238_vm0, %v251_v21, 0.0  ;;  %v255_v33 = vmul.f32 %v1114_v29, %v1114_v29  ;;  %v258_v38 = vmul.f32 %v1126_v34, %v1126_v34  ;;  %v257_v39 = vmul.f32 %v1129_v35, %v1129_v35  ;;  %v236_v54 = vld [vmem:[%s208_s28] sm:$0xff]  ;;  %s1224_s16 = scalar_lea.hbm %s1280_s3, %s653_s8  ;;  %s853_s21 = scalar_lea.vmem %s1226_s10, 128 }
  0x22   : > { %v288_v30 = vsel %vm238_vm0, %v254_v26, 0.0  ;;  %v285_v31 = vsel %vm238_vm0, %v253_v27, 0.0  ;;  %v294_v36 = vsel %vm238_vm0, %v256_v32, 0.0  ;;  %v260_v44 = vmul.f32 %v1139_v40, %v1139_v40  ;;  %p854_p0 = scmp.ne.s32.totalorder %s1226_s10, %s853_s21  ;;  %s859_s28 = scalar_lea.vmem %s858_s27, 256 }
  0x23   : > { %265 = vadd.xlane.f32.xlu0 %v264_v12  ;;  %271 = vadd.xlane.f32.xlu1 %v270_v13  ;;  %v291_v37 = vsel %vm238_vm0, %v255_v33, 0.0  ;;  %v300_v42 = vsel %vm238_vm0, %v258_v38, 0.0  ;;  %v297_v43 = vsel %vm238_vm0, %v257_v39, 0.0  ;;  %v259_v45 = vmul.f32 %v1142_v41, %v1142_v41  ;;  %p860_p4 = scmp.lt.s32.totalorder %s1226_s10, %s858_s27  ;;  %p861_p5 = scmp.lt.s32.totalorder %s859_s28, %s853_s21 }
  0x24   : > { %v306_v47 = vsel %vm238_vm0, %v260_v44, 0.0  ;;  %v237_v49 = vmul.f32 %v1155_v46, %v1155_v46  ;;  %p855_p1 = pnand %p854_p0, %p1025_p3 }
  0x25   : > { %v303_v48 = vsel %vm238_vm0, %v259_v45, 0.0  ;;  %p862_p6 = por %p861_p5, %p860_p4 }
  0x26   : > { %v239_v51 = vsel %vm238_vm0, %v237_v49, 0.0  ;;  %p856_p2 = pneg %p855_p1 }
  0x27   : > { %277 = vadd.xlane.f32.xlu1 %v276_v18  ;;  %274 = vadd.xlane.f32.xlu0 %v273_v19 }
  0x28   : > { %p863_p7 = pnand %p862_p6, %p856_p2 }
  0x2b   : > { %283 = vadd.xlane.f32.xlu1 %v282_v24  ;;  %280 = vadd.xlane.f32.xlu0 %v279_v25 }
  0x2f   : > { %289 = vadd.xlane.f32.xlu1 %v288_v30  ;;  %286 = vadd.xlane.f32.xlu0 %v285_v31 }
  0x33   : > { %295 = vadd.xlane.f32.xlu1 %v294_v36  ;;  %292 = vadd.xlane.f32.xlu0 %v291_v37 }
  0x37   : > { %301 = vadd.xlane.f32.xlu1 %v300_v42  ;;  %298 = vadd.xlane.f32.xlu0 %v297_v43 }
  0x3b   : > { %307 = vadd.xlane.f32.xlu1 %v306_v47  ;;  %304 = vadd.xlane.f32.xlu0 %v303_v48 }
  0x3f   : > { %240 = vadd.xlane.f32.xlu0 %v239_v51 }
  0x4c   : > { %484 = vperm.xlu1 %815, %v236_v54  }
  0xac   : > { %v263_v55 = vpop.xlane.xlu0 %262  ;;  %v269_v56 = vpop.xlane.xlu1 %268 }
  0xad   : > { %v309_v57 = vmax.f32 %v263_v55, 1e-24  ;;  %v311_v61 = vmax.f32 %v269_v56, 1e-24 }
  0xaf   : > { %817 = vrsqrt.f32 %v309_v57 }
  0xb0   : > { %v266_v58 = vpop.xlane.xlu0 %265  ;;  %v272_v59 = vpop.xlane.xlu1 %271 }
  0xb1   : > { %v310_v60 = vmax.f32 %v266_v58, 1e-24  ;;  %v312_v62 = vmax.f32 %v272_v59, 1e-24 }
  0xb3   : > { %819 = vrsqrt.f32 %v310_v60 }
  0xb4   : > { %v278_v63 = vpop.xlane.xlu1 %277  ;;  %821 = vrsqrt.f32 %v311_v61  ;;  %v275_v3 = vpop.xlane.xlu0 %274 }
  0xb5   : > { %823 = vrsqrt.f32 %v312_v62  ;;  %v314_v4 = vmax.f32 %v278_v63, 1e-24  ;;  %v313_v5 = vmax.f32 %v275_v3, 1e-24 }
  0xb7   : > { %825 = vrsqrt.f32 %v314_v4 }
  0xb8   : > { %827 = vrsqrt.f32 %v313_v5  ;;  %v284_v11 = vpop.xlane.xlu1 %283  ;;  %v281_v14 = vpop.xlane.xlu0 %280 }
  0xb9   : > { %v818_v7 = vpop.eup %817  ;;  %v316_v20 = vmax.f32 %v284_v11, 1e-24  ;;  %v315_v24 = vmax.f32 %v281_v14, 1e-24  ;;  %v479_v14 = vlaneseq }
  0xba   : > { %v341_v12 = vmul.f32 %v818_v7, %v1052_v0 }
  0xbb   : > { %829 = vrsqrt.f32 %v316_v20 }
  0xbc   : > { %831 = vrsqrt.f32 %v315_v24  ;;  %v290_v25 = vpop.xlane.xlu1 %289  ;;  %v287_v27 = vpop.xlane.xlu0 %286 }
  0xbd   : > { %v820_v10 = vpop.eup %819  ;;  %v318_v32 = vmax.f32 %v290_v25, 1e-24  ;;  %v317_v33 = vmax.f32 %v287_v27, 1e-24 }
  0xbe   : > { %v342_v13 = vmul.f32 %v820_v10, %v1058_v2  ;;  %v822_v18 = vpop.eup %821 }
  0xbf   : > { %v824_v21 = vpop.eup %823  ;;  %v343_v0 = vmul.f32 %v822_v18, %v1055_v1  ;;  %833 = vrsqrt.f32 %v318_v32  ;;  %v480_v18 = vand.u32 127, %v479_v14 }
  0xc0   : > { %v709_v19 = vpack.c.bf16 %v342_v13, %v341_v12  ;;  %v344_v2 = vmul.f32 %v824_v21, %v1067_v6  ;;  %835 = vrsqrt.f32 %v317_v33  ;;  %v296_v1 = vpop.xlane.xlu1 %295  ;;  %v293_v39 = vpop.xlane.xlu0 %292 }
  0xc1   : > { %v826_v26 = vpop.eup %825  ;;  %v320_v43 = vmax.f32 %v296_v1, 1e-24  ;;  %v319_v44 = vmax.f32 %v293_v39, 1e-24 }
  0xc2   : > { %711 = vmatpush3.bf16.xpose.msk.msra.mxu0 %vm1172_vm2, %v709_v19  ;;  %v828_v30 = vpop.eup %827  ;;  %v713_v31 = vpack.c.bf16 %v344_v2, %v343_v0  ;;  %v346_v37 = vmul.f32 %v826_v26, %v1072_v8  ;;  %v481_v19 = vstv %s649_s29 }
  0xc3   : > { %712 = vmatprep.subr.bf16.mxu0 %v949_v50  ;;  %v345_v36 = vmul.f32 %v828_v30, %v1075_v9  ;;  %837 = vrsqrt.f32 %v320_v43  ;;  %v482_v20 = vadd.s32 %v481_v19, %v480_v18 }
  0xc4   : > { %839 = vrsqrt.f32 %v319_v44  ;;  %v302_v8 = vpop.xlane.xlu1 %301  ;;  %v299_v49 = vpop.xlane.xlu0 %298 }
  0xc5   : > { %v830_v6 = vpop.eup %829  ;;  %v717_v38 = vpack.c.bf16 %v346_v37, %v345_v36  ;;  %v322_v52 = vmax.f32 %v302_v8, 1e-24  ;;  %v321_v53 = vmax.f32 %v299_v49, 1e-24 }
  0xc6   : > { %v832_v42 = vpop.eup %831  ;;  %v348_v9 = vmul.f32 %v830_v6, %v1086_v16 }
  0xc7   : > { %v347_v45 = vmul.f32 %v832_v42, %v1089_v17  ;;  %841 = vrsqrt.f32 %v322_v52 }
  0xc8   : > { %843 = vrsqrt.f32 %v321_v53  ;;  %v308_v16 = vpop.xlane.xlu1 %307  ;;  %v305_v57 = vpop.xlane.xlu0 %304 }
  0xc9   : > { %v834_v47 = vpop.eup %833  ;;  %v721_v48 = vpack.c.bf16 %v348_v9, %v347_v45  ;;  %v324_v59 = vmax.f32 %v308_v16, 1e-24  ;;  %v323_v60 = vmax.f32 %v305_v57, 1e-24 }
  0xca   : > { %715 = vmatpush3.bf16.xpose.msk.msra.mxu0 %vm1172_vm2, %v713_v31  ;;  %v836_v51 = vpop.eup %835  ;;  %v350_v17 = vmul.f32 %v834_v47, %v1098_v22 }
  0xcb   : > { %716 = vmatprep.subr.bf16.mxu0 %v949_v50  ;;  %v349_v54 = vmul.f32 %v836_v51, %v1101_v23  ;;  %845 = vrsqrt.f32 %v324_v59 }
  0xcc   : > { %847 = vrsqrt.f32 %v323_v60  ;;  %v241_v3 = vpop.xlane.xlu0 %240 }
  0xcd   : > { %v838_v55 = vpop.eup %837  ;;  %v725_v56 = vpack.c.bf16 %v350_v17, %v349_v54 }
  0xce   : > { %v840_v58 = vpop.eup %839  ;;  %v352_v23 = vmul.f32 %v838_v55, %v1111_v28 }
  0xcf   : > { %v351_v61 = vmul.f32 %v840_v58, %v1114_v29  ;;  %v242_v29 = vmax.f32 %v241_v3, 1e-24 }
  0xd1   : > { %v842_v22 = vpop.eup %841  ;;  %v729_v62 = vpack.c.bf16 %v352_v23, %v351_v61  ;;  %849 = vrsqrt.f32 %v242_v29 }
  0xd2   : > { %719 = vmatpush3.bf16.xpose.msk.msra.mxu0 %vm1172_vm2, %v717_v38  ;;  %v844_v63 = vpop.eup %843  ;;  %v354_v5 = vmul.f32 %v842_v22, %v1126_v34 }
  0xd3   : > { %720 = vmatprep.subr.bf16.mxu0 %v949_v50  ;;  %v353_v4 = vmul.f32 %v844_v63, %v1129_v35 }
  0xd5   : > { %v846_v28 = vpop.eup %845  ;;  %v733_v7 = vpack.c.bf16 %v354_v5, %v353_v4 }
  0xd6   : > { %v848_v10 = vpop.eup %847  ;;  %v356_v12 = vmul.f32 %v846_v28, %v1139_v40 }
  0xd7   : > { %v355_v11 = vmul.f32 %v848_v10, %v1142_v41  ;;  %v485_v41 = vpop.permute.xlu1 %484 }
  0xd8   : > { %vm486_vm3 = vcmp.eq.s32.totalorder %v482_v20, %v485_v41 }
  0xd9   : > { %v737_v35 = vpack.c.bf16 %v356_v12, %v355_v11 }
  0xda   : > { %723 = vmatpush3.bf16.xpose.msk.msra.mxu0 %vm1172_vm2, %v721_v48 }
  0xdb   : > { %724 = vmatprep.subr.bf16.mxu0 %v949_v50  ;;  %v850_v13 = vpop.eup %849 }
  0xdc   : > { %v244_v34 = vmul.f32 %v850_v13, %v1155_v46 }
  0xe2   : > { %727 = vmatpush3.bf16.xpose.msk.msra.mxu0 %vm1172_vm2, %v725_v56 }
  0xe3   : > { %728 = vmatprep.subr.bf16.mxu0 %v949_v50 }
  0xea   : > { %731 = vmatpush3.bf16.xpose.msk.msra.mxu0 %vm1172_vm2, %v729_v62 }
  0xeb   : > { %732 = vmatprep.subr.bf16.mxu0 %v949_v50 }
  0xf2   : > { %735 = vmatpush3.bf16.xpose.msk.msra.mxu0 %vm1172_vm2, %v733_v7 }
  0xf3   : > { %736 = vmatprep.subr.bf16.mxu0 %v949_v50 }
  0xfa   : > { %739 = vmatpush3.bf16.xpose.msk.msra.mxu0 %vm1172_vm2, %v737_v35 }
 0x101   : > { %706 = vmatmul.mubr.msk.f32.vlgmr.msra.gmra.mrb[0].mxu0 %vm238_vm0, %v244_v34 }
 0x1d4   : > { %v474_v40 = vpop.f32.mrb[0].mxu0 }
 0x1d5   : > { %v707_v50 = vpop.f32.mrb[1].mxu0  ;;  %v487_v21 = vsel %vm486_vm3, %v474_v40, 0.0 }
 0x1d6   : > { %488 = vadd.xlane.f32.xlu0 %v487_v21 }
 0x263   : > { %v489_v15 = vpop.xlane.xlu0 %488 }
 0x264   : > { %v490_v24 = vmul.f32 %v489_v15, %v489_v15  ;;  %v501_v32 = vmul.f32 0.87758255, %v489_v15  ;;  %v650_v37 = vadd.f32 -0.23971277, %v489_v15  ;;  %vm504_vm6 = vcmp.gt.f32.partialorder %v489_v15, -0.87758255 }
 0x266   : > { %v491_v0 = vsub.f32 1.0, %v490_v24 }
 0x268   : > { %v492_v46 = vmax.f32 %v491_v0, 0.0 }
 0x26a   : > { %v493_v2 = vmin.f32 %v492_v46, 1.0 }
 0x26c   : > { %851 = vrsqrt.f32 %v493_v2  ;;  %vm496_vm4 = vcmp.eq.f32.partialorder %v493_v2, inf  ;;  %v499_v27 = vand.u32 2147483648, %v493_v2  ;;  %vm498_vm5 = vcmp.eq.f32.partialorder %v493_v2, 0.0 }
 0x276   : > { %v852_v25 = vpop.eup %851 }
 0x277   : > { %v495_v26 = vmul.f32 %v852_v25, %v493_v2 }
 0x279   : > { %v497_v30 = vsel %vm496_vm4, %v493_v2, %v495_v26 }
 0x27a   : > { %v500_v31 = vsel %vm498_vm5, %v499_v27, %v497_v30 }
 0x27b   : > { %v502_v33 = vmul.f32 0.47942555, %v500_v31 }
 0x27d   : > { %v503_v36 = vsub.f32 %v501_v32, %v502_v33 }
 0x27f   : > { %v506_v1 = vsel %vm504_vm6, %v503_v36, %v650_v37 }
 0x280   : > { %v507_v6 = vsel %vm486_vm3, %v506_v1, %v474_v40 }
 0x281   : > { %v508_v38 = vmul.f32 30.0, %v507_v6 }
 0x283   : > { %509 = vst [vmem:[%s204_s9] sm:$0xff] %v508_v38 }
 0x284   : > { %866 = shalt.err (!%p863_p7)
}
 0x285   : > { %s867_s29 = scalar_lea.hbm %s1224_s16, 128  ;;  %s871_s6 = scalar_lea.hbm %s1280_s3, 512 }
 0x286   : > { %p868_p9 = scmp.ne.s32.totalorder %s1224_s16, %s867_s29  ;;  %p872_p12 = scmp.lt.u32.totalorder %s1224_s16, %s1280_s3 }
 0x287   : > { %p873_p13 = scmp.lt.u32.totalorder %s871_s6, %s867_s29  ;;  %p875_p1 = scmp.lt.u32.totalorder %s867_s29, %s1224_s16 }
 0x288   : > { %p869_p10 = pnand %p868_p9, %p1025_p3 }
 0x289   : > { %p874_p0 = por %p873_p13, %p872_p12 }
 0x28a   : > { %p870_p11 = pneg %p869_p10 }
 0x28b   : > { %p876_p2 = por %p875_p1, %p874_p0 }
 0x28d   : > { %p877_p4 = pnand %p876_p2, %p870_p11 }
 0x28f   : > { %880 = shalt.err (!%p877_p4)
}
 0x290   : > { %740 = dma.vmem_to_hbm [thread:$0]  (%p1025_p3), %s1226_s10, 128, %s1224_s16, %s511_s15  }
 0x291 PF: > { %p746_p5 = scmp.ge.s32.totalorder %s947_s19, 2  ;;  %s538_s9 = sand.u32 1, %s919_s12  }
 0x292   : > { %s539_s11 = scalar_lea.sflag [#allocation3], %s538_s9 }
 0x293   : > { %p743_p6 = pnand %p746_p5, %p1034_p8 }
 0x295   : > { %914 = dma.done.wait (!%p743_p6), %s539_s11, 128  }
 0x296   : > { %916 = vsyncadd (!%p743_p6), %s539_s11, 4294967168  ;;  %s16_s19 = sadd.s32 1, %s947_s19   ;;  %s1285_s12 = smov %s923_s13 }
 0x297   : > { %p13_p7 = scmp.ge.s32.totalorder %s16_s19, 6   ;;  %s1286_s13 = smov %s927_s14 }
 0x298   : > { %s1287_s14 = smov %s1043_s30  ;;  %s1288_s15 = smov %s939_s17 }
 0x299   : > { %s1289_s16 = smov %s943_s18  ;;  %s1290_s17 = smov %s1293_s22 }
 0x29a   : > { %s1291_s18 = smov %s1297_s23  ;;  %15 = sbr.rel (!%p13_p7) target bundleno = 5 (0x5), region = 73 }
 0x2a1   :  { %544 = vsyncpa [#allocation3], 1 }
 0x2a2   :  { %546 = vsyncpa [#allocation3 + $0x1], 1 }

</bundles_post_ra>
